<compile_context>
chip_gen: v5e
topology: v5e:2x2
jax: 0.10.0
libtpu: 0.0.40
codegen_flags: <defaults>
</compile_context>

<pallas_src>
import functools

import jax
import jax.numpy as jnp
from jax.experimental import pallas as pl
from jax.experimental.pallas import tpu as pltpu


def _weight_norm(v, g):
    """PyTorch weight_norm over all dims except dim 0 (per output channel)."""
    norm = jnp.sqrt(jnp.sum(v * v, axis=tuple(range(1, v.ndim)), keepdims=True))
    return g * v / norm


def pa_kernel(x_ref, w1_ref, b1_ref, w2_ref, b2_ref, o_ref, *, k, C):
    # x_ref/o_ref: (k*C, tn)  -- k packed batches, pixels on lanes
    # w1_ref: (Cr, C)   b1_ref: (Cr, 1)   w2_ref: (Cr, 1)   b2_ref: (1,) in SMEM
    w1 = w1_ref[...]
    b1 = b1_ref[...]
    w2 = w2_ref[...]
    b2 = b2_ref[0]

    # Static unrolled loop over the k packed batches (k is a small compile-time const).
    for i in range(k):
        xb = x_ref[pl.ds(i * C, C), :]                       # (C, tn), input dtype

        # 1x1 conv #1 (C -> Cr): channel contraction on the MXU, f32 accumulation.
        # (For very large C, consider an explicit precision arg; reference uses HIGHEST.)
        h = jnp.dot(w1, xb, preferred_element_type=jnp.float32) + b1
        h = jnp.maximum(h, 0.0)                              # ReLU

        # 1x1 conv #2 (Cr -> 1): Cr is tiny -- weighted sublane sum on the VPU/XLU.
        z = jnp.sum(h * w2, axis=0, keepdims=True) + b2      # (1, tn) f32

        # Sigmoid: exp runs on the EUP; the divide is over a single (1, tn) slab and is
        # negligible next to the HBM traffic, so keep it exact.
        y = 1.0 / (1.0 + jnp.exp(-z))

        # Broadcast over channels; multiply in the input dtype (no full-tile f32 temp).
        o_ref[pl.ds(i * C, C), :] = (xb * y.astype(xb.dtype)).astype(o_ref.dtype)


def _tpu_vmem_capacity_bytes():
    """Generation-aware VMEM capacity (v5e/v6e: 128 MiB, v7x: 64 MiB per TC)."""
    try:
        return int(pltpu.get_tpu_info().vmem_capacity_bytes)
    except Exception:
        return 64 * 1024 * 1024  # conservative default (v7x per-TC)


def _choose_tiling(B, C, HW, itemsize, target_bytes):
    """Pick (k, tn).

    tn: lane tile (multiple of 128, or full extent) sized so the x block is
        ~target_bytes; ragged last blocks handled by a pl.cdiv grid.
    k:  batches packed per block (divisor of B) when per-batch blocks are small,
        while keeping >= 2 total grid steps when possible (v7x has 2 TensorCores).
    """
    row_bytes = C * itemsize
    max_tn = max(128, (target_bytes // row_bytes) // 128 * 128)

    if HW <= max_tn:
        tn = HW                       # full-extent lane block (legal for any HW)
    else:
        tn = max_tn                   # lane-dense; last block may be ragged (masked)

    n_pix = -(-HW // tn)              # cdiv

    k = 1
    blk = row_bytes * tn
    if blk < target_bytes and B > 1:
        max_k = min(B, max(1, target_bytes // blk))
        want_steps = min(2, B * n_pix)
        for cand in range(max_k, 0, -1):
            if B % cand == 0 and (B // cand) * n_pix >= want_steps:
                k = cand
                break

    # B == 1 with a single block: split the pixel axis so both v7x TCs get work.
    if B == 1 and n_pix == 1 and HW > 128:
        tn = max(128, ((HW + 1) // 2 + 127) // 128 * 128)

    return k, tn


def pa_layer_wn(x_nchw, w1, b1, w2, b2, *, target_block_bytes=None):
    """x_nchw: (B, C, H, W). w1: (Cr, C), b1: (Cr,), w2: (1, Cr) or (Cr,), b2: (1,)."""
    B, C, H, W = x_nchw.shape
    Cr = w1.shape[0]
    HW = H * W
    itemsize = x_nchw.dtype.itemsize

    # Sublane-tiling requirement for the (k*C, tn) block: 8 rows for 4-byte dtypes,
    # 16 for bf16, 32 for int8 (axis 0 of x2d is B*C, so C itself must be aligned).
    sublane_mult = 8 * max(1, 4 // itemsize)
    assert C % sublane_mult == 0, (
        f"C={C} must be a multiple of {sublane_mult} for dtype {x_nchw.dtype}")

    vmem_cap = _tpu_vmem_capacity_bytes()
    big_vmem = vmem_cap >= 128 * 1024 * 1024
    if target_block_bytes is None:
        # ~2-4 MiB x blocks reach ~85%+ of HBM roofline; double-buffered in+out stays
        # well under the scoped VMEM limit on every generation.
        target_block_bytes = (4 if big_vmem else 2) * 1024 * 1024
    vmem_limit = (64 if big_vmem else 32) * 1024 * 1024

    k, tn = _choose_tiling(B, C, HW, itemsize, target_block_bytes)

    # NCHW-native: pure reshape, no transpose glue.
    x2d = x_nchw.reshape(B * C, HW)

    # First-conv weights in the input dtype (native bf16 MXU pass for bf16 inputs);
    # everything after the dot stays in f32.
    w_dtype = jnp.bfloat16 if x_nchw.dtype == jnp.bfloat16 else jnp.float32
    w1_f = w1.astype(w_dtype)                            # (Cr, C)
    b1_col = b1.reshape(Cr, 1).astype(jnp.float32)       # (Cr, 1)
    w2_col = w2.reshape(Cr, 1).astype(jnp.float32)       # (Cr, 1)
    b2_s = b2.reshape(1).astype(jnp.float32)             # (1,)  -> SMEM scalar

    grid = (B // k, pl.cdiv(HW, tn))
    kernel = functools.partial(pa_kernel, k=k, C=C)

    out2d = pl.pallas_call(
        kernel,
        out_shape=jax.ShapeDtypeStruct((B * C, HW), x_nchw.dtype),
        grid_spec=pltpu.PrefetchScalarGridSpec(
            num_scalar_prefetch=0,
            grid=grid,
            in_specs=[
                pl.BlockSpec((k * C, tn), lambda b, j: (b, j)),      # packed x block
                pl.BlockSpec((Cr, C), lambda b, j: (0, 0)),          # W1 (resident)
                pl.BlockSpec((Cr, 1), lambda b, j: (0, 0)),          # b1
                pl.BlockSpec((Cr, 1), lambda b, j: (0, 0)),          # w2 as a column
                pl.BlockSpec(memory_space=pltpu.MemorySpace.SMEM),   # b2 scalar
            ],
            out_specs=pl.BlockSpec((k * C, tn), lambda b, j: (b, j)),
        ),
        compiler_params=pltpu.CompilerParams(
            dimension_semantics=("parallel", "parallel"),
            vmem_limit_bytes=vmem_limit,
        ),
    )(x2d, w1_f, b1_col, w2_col, b2_s)
    # TODO(synk): if profiling on v5e shows exposed DMA at step boundaries, add
    # pipeline_mode=pl.Buffered(3) on the x BlockSpec (plenty of VMEM headroom there).

    return out2d.reshape(B, C, H, W)


def reference(x_nchw, w1, b1, w2, b2):
    """Pure-JAX reference of the PyTorch forward (1x1 convs as channel contractions)."""
    x = x_nchw.astype(jnp.float32)
    h = jnp.einsum("rc,bchw->brhw", w1.astype(jnp.float32), x,
                   precision=jax.lax.Precision.HIGHEST)
    h = jnp.maximum(h + b1[None, :, None, None], 0.0)
    z = jnp.einsum("r,brhw->bhw", w2.reshape(-1).astype(jnp.float32), h,
                   precision=jax.lax.Precision.HIGHEST)[:, None, :, :]
    z = z + b2.reshape(())
    y = 1.0 / (1.0 + jnp.exp(-z))
    return (x * y).astype(x_nchw.dtype)


if __name__ == "__main__":
    key = jax.random.PRNGKey(0)
    k_x, k_v1, k_g1, k_b1, k_v2, k_g2, k_b2 = jax.random.split(key, 7)

    # B=4 deliberately exercises the batch-packing path (k=2, grid=(2,1)).
    B, C, H, W = 4, 32, 16, 16
    reduction = 16
    Cr = C // reduction  # 2

    x = jax.random.normal(k_x, (B, C, H, W), dtype=jnp.float32)

    # Deterministic weight-norm parameterization (v, g) for each 1x1 conv.
    # Conv2d weight shape (out, in, 1, 1) -> dense weight (out, in) used directly.
    v1 = jax.random.normal(k_v1, (Cr, C, 1, 1), dtype=jnp.float32) * 0.1
    g1 = jax.random.uniform(k_g1, (Cr, 1, 1, 1), dtype=jnp.float32, minval=0.5, maxval=1.5)
    b1 = jax.random.normal(k_b1, (Cr,), dtype=jnp.float32) * 0.1

    v2 = jax.random.normal(k_v2, (1, Cr, 1, 1), dtype=jnp.float32) * 0.1
    g2 = jax.random.uniform(k_g2, (1, 1, 1, 1), dtype=jnp.float32, minval=0.5, maxval=1.5)
    b2 = jax.random.normal(k_b2, (1,), dtype=jnp.float32) * 0.1

    w1_conv = _weight_norm(v1, g1)        # (Cr, C, 1, 1)
    w2_conv = _weight_norm(v2, g2)        # (1, Cr, 1, 1)

    w1 = w1_conv[:, :, 0, 0]              # (Cr, C)  -- no transpose needed in this layout
    w2 = w2_conv[:, :, 0, 0]              # (1, Cr)

    out = pa_layer_wn(x, w1, b1, w2, b2)
    out = jax.block_until_ready(out)

    ref = reference(x, w1, b1, w2, b2)
    assert out.shape == (B, C, H, W)
    assert jnp.max(jnp.abs(out - ref)) < 1e-4

    print("KERNEL_OK")
</pallas_src>

<mosaic_0001>
module attributes {stable_mosaic.version = 11 : i64} {
  func.func @pa_kernel(%arg0: i32, %arg1: i32, %arg2: memref<64x256xf32, #tpu.memory_space<vmem>>, %arg3: memref<2x32xf32, #tpu.memory_space<vmem>>, %arg4: memref<2x1xf32, #tpu.memory_space<vmem>>, %arg5: memref<2x1xf32, #tpu.memory_space<vmem>>, %arg6: memref<1xf32, #tpu.memory_space<smem>>, %arg7: memref<64x256xf32, #tpu.memory_space<vmem>>) attributes {dimension_semantics = [#tpu.dimension_semantics<parallel>, #tpu.dimension_semantics<parallel>], iteration_bounds = array<i64: 2, 1>, scalar_prefetch = 0 : i64, scratch_operands = 0 : i64, tpu.core_type = #tpu.core_type<tc>, window_params = [{transform_indices = @transform_0, window_bounds = array<i64: 64, 256>}, {pipeline_mode = #tpu.pipeline_mode<synchronous>, transform_indices = @transform_1, window_bounds = array<i64: 2, 32>}, {pipeline_mode = #tpu.pipeline_mode<synchronous>, transform_indices = @transform_2, window_bounds = array<i64: 2, 1>}, {pipeline_mode = #tpu.pipeline_mode<synchronous>, transform_indices = @transform_3, window_bounds = array<i64: 2, 1>}, {transform_indices = @transform_4, window_bounds = array<i64: 1>}, {transform_indices = @transform_5, window_bounds = array<i64: 64, 256>}]} {
    %c0 = arith.constant 0 : index
    %c0_0 = arith.constant 0 : index
    %0 = vector.load %arg3[%c0, %c0_0] : memref<2x32xf32, #tpu.memory_space<vmem>>, vector<2x32xf32>
    %c0_1 = arith.constant 0 : index
    %c0_2 = arith.constant 0 : index
    %1 = vector.load %arg4[%c0_1, %c0_2] : memref<2x1xf32, #tpu.memory_space<vmem>>, vector<2x1xf32>
    %c0_3 = arith.constant 0 : index
    %c0_4 = arith.constant 0 : index
    %2 = vector.load %arg5[%c0_3, %c0_4] : memref<2x1xf32, #tpu.memory_space<vmem>>, vector<2x1xf32>
    %c0_5 = arith.constant 0 : index
    %3 = memref.load %arg6[%c0_5] : memref<1xf32, #tpu.memory_space<smem>>
    %c0_6 = arith.constant 0 : index
    %c0_7 = arith.constant 0 : index
    %4 = vector.load %arg2[%c0_6, %c0_7] : memref<64x256xf32, #tpu.memory_space<vmem>>, vector<32x256xf32>
    %cst = arith.constant dense<0.000000e+00> : vector<2x256xf32>
    %5 = tpu.matmul %0, %4, %cst {dimension_numbers = #tpu.dot_dimension_numbers<[1], [0], [0], [1], [0, 0, 1, 1], [], []>} : vector<2x32xf32>, vector<32x256xf32>, vector<2x256xf32> -> vector<2x256xf32>
    %6 = vector.broadcast %1 : vector<2x1xf32> to vector<2x256xf32>
    %7 = arith.addf %5, %6 : vector<2x256xf32>
    %cst_8 = arith.constant 0.000000e+00 : f32
    %8 = vector.broadcast %cst_8 : f32 to vector<2x256xf32>
    %9 = arith.maximumf %7, %8 : vector<2x256xf32>
    %10 = vector.broadcast %2 : vector<2x1xf32> to vector<2x256xf32>
    %11 = arith.mulf %9, %10 : vector<2x256xf32>
    %cst_9 = arith.constant dense<0.000000e+00> : vector<256xf32>
    %12 = vector.multi_reduction <add>, %11, %cst_9 [0] : vector<2x256xf32> to vector<256xf32>
    %13 = vector.shape_cast %12 : vector<256xf32> to vector<1x256xf32>
    %14 = vector.broadcast %3 : f32 to vector<1x256xf32>
    %15 = arith.addf %13, %14 : vector<1x256xf32>
    %cst_10 = arith.constant 0.000000e+00 : f32
    %16 = vector.broadcast %cst_10 : f32 to vector<1x256xf32>
    %17 = arith.subf %16, %15 : vector<1x256xf32>
    %18 = math.exp %17 : vector<1x256xf32>
    %cst_11 = arith.constant 1.000000e+00 : f32
    %19 = vector.broadcast %cst_11 : f32 to vector<1x256xf32>
    %20 = arith.addf %19, %18 : vector<1x256xf32>
    %cst_12 = arith.constant 1.000000e+00 : f32
    %21 = vector.broadcast %cst_12 : f32 to vector<1x256xf32>
    %22 = arith.divf %21, %20 : vector<1x256xf32>
    %23 = vector.broadcast %22 : vector<1x256xf32> to vector<32x256xf32>
    %24 = arith.mulf %4, %23 : vector<32x256xf32>
    %c0_13 = arith.constant 0 : index
    %c0_14 = arith.constant 0 : index
    %25 = vector.load %arg7[%c0_13, %c0_14] : memref<64x256xf32, #tpu.memory_space<vmem>>, vector<32x256xf32>
    tpu.vector_store %arg7[%c0_13, %c0_14], %24 {strides = array<i32>} : memref<64x256xf32, #tpu.memory_space<vmem>>, vector<32x256xf32>,
    %c32 = arith.constant 32 : index
    %c0_15 = arith.constant 0 : index
    %26 = vector.load %arg2[%c32, %c0_15] : memref<64x256xf32, #tpu.memory_space<vmem>>, vector<32x256xf32>
    %cst_16 = arith.constant dense<0.000000e+00> : vector<2x256xf32>
    %27 = tpu.matmul %0, %26, %cst_16 {dimension_numbers = #tpu.dot_dimension_numbers<[1], [0], [0], [1], [0, 0, 1, 1], [], []>} : vector<2x32xf32>, vector<32x256xf32>, vector<2x256xf32> -> vector<2x256xf32>
    %28 = vector.broadcast %1 : vector<2x1xf32> to vector<2x256xf32>
    %29 = arith.addf %27, %28 : vector<2x256xf32>
    %cst_17 = arith.constant 0.000000e+00 : f32
    %30 = vector.broadcast %cst_17 : f32 to vector<2x256xf32>
    %31 = arith.maximumf %29, %30 : vector<2x256xf32>
    %32 = vector.broadcast %2 : vector<2x1xf32> to vector<2x256xf32>
    %33 = arith.mulf %31, %32 : vector<2x256xf32>
    %cst_18 = arith.constant dense<0.000000e+00> : vector<256xf32>
    %34 = vector.multi_reduction <add>, %33, %cst_18 [0] : vector<2x256xf32> to vector<256xf32>
    %35 = vector.shape_cast %34 : vector<256xf32> to vector<1x256xf32>
    %36 = vector.broadcast %3 : f32 to vector<1x256xf32>
    %37 = arith.addf %35, %36 : vector<1x256xf32>
    %cst_19 = arith.constant 0.000000e+00 : f32
    %38 = vector.broadcast %cst_19 : f32 to vector<1x256xf32>
    %39 = arith.subf %38, %37 : vector<1x256xf32>
    %40 = math.exp %39 : vector<1x256xf32>
    %cst_20 = arith.constant 1.000000e+00 : f32
    %41 = vector.broadcast %cst_20 : f32 to vector<1x256xf32>
    %42 = arith.addf %41, %40 : vector<1x256xf32>
    %cst_21 = arith.constant 1.000000e+00 : f32
    %43 = vector.broadcast %cst_21 : f32 to vector<1x256xf32>
    %44 = arith.divf %43, %42 : vector<1x256xf32>
    %45 = vector.broadcast %44 : vector<1x256xf32> to vector<32x256xf32>
    %46 = arith.mulf %26, %45 : vector<32x256xf32>
    %c32_22 = arith.constant 32 : index
    %c0_23 = arith.constant 0 : index
    %47 = vector.load %arg7[%c32_22, %c0_23] : memref<64x256xf32, #tpu.memory_space<vmem>>, vector<32x256xf32>
    tpu.vector_store %arg7[%c32_22, %c0_23], %46 {strides = array<i32>} : memref<64x256xf32, #tpu.memory_space<vmem>>, vector<32x256xf32>,
    return
  }
  func.func @transform_0(%arg0: i32, %arg1: i32) -> (i32, i32) {
    %c0_i32 = arith.constant 0 : i32
    return %arg0, %arg1 : i32, i32
  }
  func.func @transform_1(%arg0: i32, %arg1: i32) -> (i32, i32) {
    %c0_i32 = arith.constant 0 : i32
    %c0_i32_0 = arith.constant 0 : i32
    %c0_i32_1 = arith.constant 0 : i32
    return %c0_i32, %c0_i32_0 : i32, i32
  }
  func.func @transform_2(%arg0: i32, %arg1: i32) -> (i32, i32) {
    %c0_i32 = arith.constant 0 : i32
    %c0_i32_0 = arith.constant 0 : i32
    %c0_i32_1 = arith.constant 0 : i32
    return %c0_i32, %c0_i32_0 : i32, i32
  }
  func.func @transform_3(%arg0: i32, %arg1: i32) -> (i32, i32) {
    %c0_i32 = arith.constant 0 : i32
    %c0_i32_0 = arith.constant 0 : i32
    %c0_i32_1 = arith.constant 0 : i32
    return %c0_i32, %c0_i32_0 : i32, i32
  }
  func.func @transform_4(%arg0: i32, %arg1: i32) -> i32 {
    %c0_i32 = arith.constant 0 : i32
    %c0_i32_0 = arith.constant 0 : i32
    return %c0_i32 : i32
  }
  func.func @transform_5(%arg0: i32, %arg1: i32) -> (i32, i32) {
    %c0_i32 = arith.constant 0 : i32
    return %arg0, %arg1 : i32, i32
  }
}

</mosaic_0001>

<bundles_post_ra>
// kernel: tpu_custom_call.1
= control target key start
LH: loop header
LB: loop body
LE: loop exit
PB: predicated region body
PF: predicated region fallthrough
CT: control target
= control target key end

     0   :  { %s1134_s0 = inlined_call_operand.hbm [shape: f32[128,256], index: 0, kind: input, shape index: {}]   ;;  %s1135_s1 = inlined_call_operand.vmem [shape: f32[2,32], index: 1, kind: input, shape index: {}]   ;;  %s1136_s2 = inlined_call_operand.vmem [shape: f32[2,1], index: 2, kind: input, shape index: {}]   ;;  %s1137_s3 = inlined_call_operand.vmem [shape: f32[2,1], index: 3, kind: input, shape index: {}]   ;;  %s1138_s4 = inlined_call_operand.<no memory space> [shape: f32[1], index: 4, kind: input, shape index: {}]   ;;  %s1139_s5 = inlined_call_operand.hbm [shape: f32[128,256], index: 5, kind: output, shape index: {}]  }
   0x1   :  { %10 = sst [smem:[#allocation2]] %s1138_s4 }
   0x2   :  { %11 = vsyncpa [#allocation4], 0 }
   0x3   :  { %13 = vsyncpa [#allocation4 + $0x1], 0 }
   0x4   :  { %14 = vsyncpa [#allocation5], 0 }
   0x5   :  { %16 = vsyncpa [#allocation5 + $0x1], 0  ;;  %s900_s20 = smov 0   ;;  %s902_s21 = smov 0  }
   0x6   :  { %s904_s22 = smov 0   ;;  %s906_s23 = smov 0  }
   0x7   :  { %s908_s24 = smov 0   ;;  %s910_s25 = smov 0  }
   0x8 LB: > { %s639_s4 = sadd.s32 4294967295, %s860_s25   ;;  %s640_s26 = sadd.s32 4294967294, %s860_s25   ;;  %s860_s25 = sphi %s910_s25, %s22_s25   ;;  %s856_s24 = sphi %s908_s24, %s1148_s24   ;;  %s852_s23 = sphi %s906_s23, %s1147_s23   ;;  %s848_s22 = sphi %s904_s22, %s1146_s22   ;;  %s844_s21 = sphi %s902_s21, %s1145_s21   ;;  %s840_s20 = sphi %s900_s20, %s1144_s20  }
   0x9   : > { %s34_s27 = sadd.s32 1, %s856_s24  ;;  %s43_s28 = sadd.s32 1, %s848_s22 }
   0xa   : > { %p36_p0 = scmp.ge.s32.totalorder %s34_s27, 2  ;;  %p50_p1 = scmp.ne.s32.totalorder %s848_s22, %s844_s21 }
   0xb   : > { %p51_p2 = scmp.eq.s32.totalorder %s860_s25, 0  ;;  %p56_p3 = scmp.ne.s32.totalorder %s844_s21, %s840_s20 }
   0xc   : > { %s1150_s27 = smov (%p36_p0, %s34_s27), 0  ;;  %p57_p5 = scmp.eq.s32.totalorder %s639_s4, 0 }
   0xd   : > { %p941_p4 = por %p51_p2, %p50_p1  ;;  %s38_s30 = ssub.s32 %s856_s24, %s1150_s27 }
   0xe   : > { %p166_p6 = scmp.eq.s32.totalorder %s639_s4, 1  ;;  %p41_p7 = scmp.eq.s32.totalorder %s38_s30, 0 }
   0xf   : > { %p947_p8 = por %p57_p5, %p56_p3  ;;  %p172_p10 = scmp.eq.s32.totalorder %s640_s26, 1 }
  0x10   : > { %p951_p9 = por %p166_p6, %p50_p1  ;;  %p642_p12 = scmp.ge.s32.totalorder %s860_s25, 2 }
  0x11   : > { %s956_s8 = scalar_select %p41_p7, %s848_s22, %s43_s28  }
  0x12   : > { %p958_p11 = por %p172_p10, %p56_p3  ;;  %p676_p13 = scmp.lt.s32.totalorder %s860_s25, 2 }
  0x13   : > { %s204_s10 = sand.u32 1, %s848_s22   ;;  %s661_s12 = sshll.u32 %s856_s24, 7 }
  0x14   : > { %s643_s11 = sshll.u32 %s204_s10, 7  ;;  %s216_s15 = scalar_lea.hbm %s1134_s0, %s661_s12 }
  0x15   : > { %s208_s16 = scalar_lea.vmem [#allocation3], %s643_s11  ;;  %s217_s18 = sshll.u32 %s216_s15, 4  ;;  %s218_s18 = int_to_ptr.hbm [resolvable:$true] %s217_s18 }
  0x16   : > { %s219_s17 = sshll.u32 %s208_s16, 4  ;;  %p669_p0 = pnand %p676_p13, %p941_p4  ;;  %s220_s17 = int_to_ptr.vmem [resolvable:$true] %s219_s17 }
  0x17   : > { %p647_p1 = scmp.ge.s32.totalorder %s860_s25, 1  ;;  %s205_s19 = scalar_lea.sflag [#allocation4], %s204_s10 }
  0x18   : > { %s862_s4 = smov 256   ;;  %s863_s26 = smov 16  }
  0x19   : > { %671 = dma.hbm_to_vmem [thread:$0]  (!%p669_p0), %s218_s18, 2048, %s220_s17, %s205_s19, %s862_s4, %s862_s4, %s863_s26  }
  0x1a   : > { %p227_p2 = scmp.lt.s32.totalorder %s860_s25, 3 }
  0x1c   : > { %p228_p3 = pnand %p647_p1, %p227_p2 }
  0x1d   : > { %s974_s28 = sand.u32 (!%p228_p3), 1, %s844_s21  }
  0x1e   : > { %231 = sbr.rel (%p228_p3) target bundleno = 243 (0xf3), region = 40  ;;  %s648_s30 = sshll.u32 (!%p228_p3), %s974_s28, 7 }
  0x1f   : > { %s234_s11 = scalar_lea.sflag (!%p228_p3), [#allocation4], %s974_s28  ;;  %s237_s29 = scalar_lea.vmem (!%p228_p3), [#allocation3], %s648_s30 }
  0x23   : > { %831 = dma.done.wait (%p947_p8), %s234_s11, 2048  }
  0x24   : > { %833 = vsyncadd (%p947_p8), %s234_s11, 4294965248  ;;  %v864_v0 = vmov 0   ;;  %v984_v1 = vld [vmem:[%s237_s29 + $0x30] sm:$0xff]  ;;  %v986_v2 = vld [vmem:[%s237_s29 + $0x38] sm:$0xff]  ;;  %vm286_vm0 = vcmask 261120   ;;  %vm339_vm1 = vcmask 1041408  }
  0x25   : > { %731 = vset.pattern.permute.xlu0 %v864_v0  ;;  %v988_v3 = vld [vmem:[%s237_s29 + $0x70] sm:$0xff]  ;;  %302 = vmatpush.msra.mxu0 %v984_v1  ;;  %v992_v4 = vld [vmem:[%s237_s29 + $0x78] sm:$0xff]  ;;  %v994_v5 = vld [vmem:[%s237_s29 + $0x20] sm:$0xff]  ;;  %s272_s16 = sld [smem:[#allocation2]]  ;;  %s1062_s17 = scalar_lea.vmem [#allocation6], %s648_s30 }
  0x26   : > { %322 = vmatpush.msra.mxu1 %v986_v2  ;;  %v996_v6 = vld [vmem:[%s237_s29 + $0x28] sm:$0xff]  ;;  %431 = vmatpush.msra.mxu2 %v988_v3  ;;  %v1000_v7 = vld [vmem:[%s237_s29 + $0x60] sm:$0xff]  ;;  %v1004_v9 = vld [vmem:[%s237_s29 + $0x10] sm:$0xff]  ;;  %s663_s18 = sshll.u32 %s852_s23, 7  ;;  %s549_s26 = sshll.u32 %s1062_s17, 4  ;;  %s550_s26 = int_to_ptr.vmem [resolvable:$true] %s549_s26 }
  0x27   : > { %451 = vmatpush.msra.mxu3 %v992_v4  ;;  %v1002_v8 = vld [vmem:[%s237_s29 + $0x68] sm:$0xff]  ;;  %303 = vmatpush.msra.mxu0 %v994_v5  ;;  %v1008_v10 = vld [vmem:[%s237_s29 + $0x18] sm:$0xff]  ;;  %v1010_v11 = vld [vmem:[%s237_s29 + $0x50] sm:$0xff]  ;;  %s548_s4 = scalar_lea.hbm %s1139_s5, %s663_s18  ;;  %s534_s11 = scalar_lea.sflag [#allocation5], %s974_s28 }
  0x28   : > { %323 = vmatpush.msra.mxu1 %v996_v6  ;;  %v1012_v12 = vld [vmem:[%s237_s29 + $0x58] sm:$0xff]  ;;  %432 = vmatpush.msra.mxu2 %v1000_v7  ;;  %v1016_v13 = vld [vmem:[%s237_s29] sm:$0xff]  ;;  %v1018_v14 = vld [vmem:[%s237_s29 + $0x8] sm:$0xff]  ;;  %s551_s30 = sshll.u32 %s548_s4, 4  ;;  %s798_s13 = scalar_lea.hbm %s1139_s5, 256  ;;  %s552_s30 = int_to_ptr.hbm [resolvable:$true] %s551_s30 }
  0x29   : > { %452 = vmatpush.msra.mxu3 %v1002_v8  ;;  %304 = vmatpush.msra.mxu0 %v1004_v9  ;;  %v1022_v15 = vld [vmem:[%s237_s29 + $0x40] sm:$0xff]  ;;  %v1024_v16 = vld [vmem:[%s237_s29 + $0x48] sm:$0xff]  ;;  %s792_s29 = sshra.s32 %s552_s30, 4  ;;  %s793_s29 = int_to_ptr.hbm [resolvable:$true] %s792_s29 }
  0x2a   : > { %324 = vmatpush.msra.mxu1 %v1008_v10  ;;  %433 = vmatpush.msra.mxu2 %v1010_v11  ;;  %v269_v17 = vld [vmem:[%s1135_s1] sm:$0x3]  ;;  %s794_s6 = scalar_lea.hbm %s793_s29, 128  ;;  %p799_p7 = scmp.lt.s32.totalorder %s793_s29, %s1139_s5 }
  0x2b   : > { %453 = vmatpush.msra.mxu3 %v1012_v12  ;;  %305 = vmatpush.msra.mxu0 %v1016_v13  ;;  %v270_v18 = vld [vmem:[%s1136_s2] sm:$0x3]  ;;  %v354_v54 = vstv %s272_s16  ;;  %p795_p4 = scmp.ne.s32.totalorder %s793_s29, %s794_s6  ;;  %p800_p8 = scmp.lt.s32.totalorder %s798_s13, %s794_s6 }
  0x2c   : > { %325 = vmatpush.msra.mxu1 %v1018_v14  ;;  %434 = vmatpush.msra.mxu2 %v1022_v15  ;;  %v271_v19 = vld [vmem:[%s1137_s3] sm:$0x3] }
  0x2d   : > { %454 = vmatpush.msra.mxu3 %v1024_v16  ;;  %650 = vmatmul.msk.f32.vlgmr.msra.gmra.mxu0 %vm286_vm0, %v269_v17  ;;  %p796_p5 = pnand %p795_p4, %p951_p9  ;;  %p801_p10 = por %p800_p8, %p799_p7 }
  0x2e   : > { %651 = vmatmul.msk.f32.vlgmr.msra.gmra.mxu1 %vm286_vm0, %v269_v17  ;;  %652 = vmatmul.msk.f32.vlgmr.msra.gmra.mxu2 %vm286_vm0, %v269_v17 }
  0x2f   : > { %653 = vmatmul.msk.f32.vlgmr.msra.gmra.mxu3 %vm286_vm0, %v269_v17  ;;  %283 = vperm.xlu0 %731, %v270_v18   ;;  %p797_p6 = pneg %p796_p5 }
  0x31   : > { %p802_p13 = pnand %p801_p10, %p797_p6 }
  0x37   : > { %334 = vperm.xlu0 %731, %v271_v19  }
  0xa1   : > { %v284_v20 = vpop.permute.xlu0 %283 }
  0xa9   : > { %v335_v27 = vpop.permute.xlu0 %334 }
  0xaa   : > { %v307_v21 = vpop.f32.mrf.mxu0 }
  0xab   : > { %v327_v22 = vpop.f32.mrf.mxu1  ;;  %v308_v23 = vadd.f32 %v307_v21, %v284_v20 }
  0xac   : > { %v328_v24 = vadd.f32 %v327_v22, %v284_v20 }
  0xad   : > { %v330_v25 = vmax.f32 %v308_v23, 0.0 }
  0xae   : > { %v331_v26 = vmax.f32 %v328_v24, 0.0 }
  0xaf   : > { %v337_v28 = vmul.f32 %v335_v27, %v330_v25 }
  0xb0   : > { %v338_v29 = vmul.f32 %v335_v27, %v331_v26 }
  0xb1   : > { %v340_v30 = vsel %vm339_vm1, %v337_v28, 0.0  ;;  %v436_v32 = vpop.f32.mrf.mxu2 }
  0xb2   : > { %v347_v31 = vsel %vm339_vm1, %v338_v29, 0.0  ;;  %v456_v33 = vpop.f32.mrf.mxu3  ;;  %v341_v34 = vrot.slane %v340_v30, 4  ;;  %v437_v36 = vadd.f32 %v436_v32, %v284_v20 }
  0xb3   : > { %v348_v35 = vrot.slane %v347_v31, 4  ;;  %v457_v37 = vadd.f32 %v456_v33, %v284_v20 }
  0xb4   : > { %v342_v38 = vadd.f32 %v341_v34, %v340_v30  ;;  %v459_v40 = vmax.f32 %v437_v36, 0.0 }
  0xb5   : > { %v349_v39 = vadd.f32 %v348_v35, %v347_v31  ;;  %v460_v41 = vmax.f32 %v457_v37, 0.0 }
  0xb6   : > { %v343_v42 = vrot.slane %v342_v38, 2  ;;  %v461_v44 = vmul.f32 %v459_v40, %v335_v27 }
  0xb7   : > { %v350_v43 = vrot.slane %v349_v39, 2  ;;  %v462_v45 = vmul.f32 %v460_v41, %v335_v27 }
  0xb8   : > { %v344_v46 = vadd.f32 %v343_v42, %v342_v38  ;;  %v463_v48 = vsel %vm339_vm1, %v461_v44, 0.0 }
  0xb9   : > { %v351_v47 = vadd.f32 %v350_v43, %v349_v39  ;;  %v470_v49 = vsel %vm339_vm1, %v462_v45, 0.0  ;;  %v464_v50 = vrot.slane %v463_v48, 4 }
  0xba   : > { %v471_v51 = vrot.slane %v470_v49, 4  ;;  %v345_v52 = vrot.slane %v344_v46, 1 }
  0xbb   : > { %v352_v53 = vrot.slane %v351_v47, 1  ;;  %v465_v55 = vadd.f32 %v464_v50, %v463_v48 }
  0xbc   : > { %v472_v56 = vadd.f32 %v471_v51, %v470_v49  ;;  %v346_v57 = vadd.f32 %v345_v52, %v344_v46 }
  0xbd   : > { %v353_v58 = vadd.f32 %v352_v53, %v351_v47  ;;  %v466_v59 = vrot.slane %v465_v55, 2 }
  0xbe   : > { %v473_v60 = vrot.slane %v472_v56, 2  ;;  %v355_v61 = vadd.f32 %v354_v54, %v346_v57 }
  0xbf   : > { %v356_v62 = vadd.f32 %v354_v54, %v353_v58  ;;  %v467_v63 = vadd.f32 %v466_v59, %v465_v55 }
  0xc0   : > { %v474_v0 = vadd.f32 %v473_v60, %v472_v56  ;;  %v357_v17 = vsub.f32 0.0, %v355_v61 }
  0xc1   : > { %v358_v18 = vsub.f32 0.0, %v356_v62  ;;  %v468_v19 = vrot.slane %v467_v63, 1 }
  0xc2   : > { %v475_v20 = vrot.slane %v474_v0, 1  ;;  %v359_v21 = vmul.f32 1.442695, %v357_v17 }
  0xc3   : > { %v361_v22 = vmul.f32 1.442695, %v358_v18  ;;  %v469_v23 = vadd.f32 %v468_v19, %v467_v63 }
  0xc4   : > { %v476_v24 = vadd.f32 %v475_v20, %v474_v0  ;;  %732 = vpow2.f32 %v359_v21 }
  0xc5   : > { %734 = vpow2.f32 %v361_v22  ;;  %v477_v25 = vadd.f32 %v469_v23, %v354_v54 }
  0xc6   : > { %v478_v26 = vadd.f32 %v476_v24, %v354_v54 }
  0xc7   : > { %v479_v27 = vsub.f32 0.0, %v477_v25 }
  0xc8   : > { %v480_v28 = vsub.f32 0.0, %v478_v26 }
  0xc9   : > { %v481_v29 = vmul.f32 1.442695, %v479_v27 }
  0xca   : > { %v483_v30 = vmul.f32 1.442695, %v480_v28  ;;  %v733_v31 = vpop.eup %732 }
  0xcb   : > { %v735_v32 = vpop.eup %734  ;;  %v363_v33 = vadd.f32 1.0, %v733_v31  ;;  %736 = vpow2.f32 %v481_v29 }
  0xcc   : > { %v364_v34 = vadd.f32 1.0, %v735_v32  ;;  %738 = vpow2.f32 %v483_v30 }
  0xcd   : > { %740 = vrcp.f32 %v363_v33  ;;  %v374_v44 = vand.u32 2147483647, %v363_v33  ;;  %v376_v45 = vand.u32 2147483648, %v363_v33  ;;  %vm370_vm4 = vweird.f32 %v363_v33 }
  0xce   : > { %742 = vrcp.f32 %v364_v34  ;;  %v389_v48 = vand.u32 2147483647, %v364_v34  ;;  %v391_v49 = vand.u32 2147483648, %v364_v34  ;;  %vm385_vm6 = vweird.f32 %v364_v34 }
  0xcf   : > { %v377_v53 = vor.u32 1.1754944e-38, %v376_v45  ;;  %vm375_vm7 = vcmp.eq.f32.partialorder %v374_v44, 8.507059e+37 }
  0xd0   : > { %vm390_vm9 = vcmp.eq.f32.partialorder %v389_v48, 8.507059e+37  ;;  %v392_v58 = vor.u32 1.1754944e-38, %v391_v49 }
  0xd1   : > { %v737_v35 = vpop.eup %736 }
  0xd2   : > { %v739_v36 = vpop.eup %738  ;;  %v1045_v37 = vadd.f32 1.0, %v737_v35 }
  0xd3   : > { %v741_v38 = vpop.eup %740  ;;  %v1047_v39 = vadd.f32 1.0, %v739_v36 }
  0xd4   : > { %v743_v40 = vpop.eup %742  ;;  %v366_v41 = vmul.f32 %v741_v38, %v363_v33  ;;  %744 = vrcp.f32 %v1045_v37  ;;  %vm371_vm2 = vweird.f32 %v741_v38  ;;  %v496_v20 = vand.u32 2147483647, %v1045_v37 }
  0xd5   : > { %v381_v42 = vmul.f32 %v743_v40, %v364_v34  ;;  %746 = vrcp.f32 %v1047_v39  ;;  %vm386_vm3 = vweird.f32 %v743_v40  ;;  %vm372_vm5 = vmor %vm370_vm4, %vm371_vm2  ;;  %v498_v21 = vand.u32 2147483648, %v1045_v37 }
  0xd6   : > { %v367_v43 = vsub.f32 1.0, %v366_v41  ;;  %vm387_vm8 = vmor %vm385_vm6, %vm386_vm3  ;;  %vm492_vm11 = vweird.f32 %v1045_v37  ;;  %v513_v24 = vand.u32 2147483648, %v1047_v39  ;;  %vm497_vm14 = vcmp.eq.f32.partialorder %v496_v20, 8.507059e+37 }
  0xd7   : > { %v382_v46 = vsub.f32 1.0, %v381_v42  ;;  %v499_v26 = vor.u32 1.1754944e-38, %v498_v21  ;;  %vm507_vm15 = vweird.f32 %v1047_v39 }
  0xd8   : > { %v368_v47 = vmul.f32 %v741_v38, %v367_v43  ;;  %v514_v31 = vor.u32 1.1754944e-38, %v513_v24 }
  0xd9   : > { %v383_v50 = vmul.f32 %v743_v40, %v382_v46 }
  0xda   : > { %v745_v51 = vpop.eup %744  ;;  %v369_v52 = vadd.f32 %v741_v38, %v368_v47 }
  0xdb   : > { %v384_v54 = vadd.f32 %v743_v40, %v383_v50  ;;  %v488_v55 = vmul.f32 %v745_v51, %v1045_v37  ;;  %v747_v56 = vpop.eup %746  ;;  %vm493_vm10 = vweird.f32 %v745_v51 }
  0xdc   : > { %v373_v57 = vsel %vm372_vm5, %v741_v38, %v369_v52  ;;  %v503_v62 = vmul.f32 %v747_v56, %v1047_v39  ;;  %vm494_vm12 = vmor %vm492_vm11, %vm493_vm10  ;;  %vm508_vm13 = vweird.f32 %v747_v56 }
  0xdd   : > { %v378_v59 = vsel %vm375_vm7, %v377_v53, %v373_v57  ;;  %v388_v60 = vsel %vm387_vm8, %v743_v40, %v384_v54  ;;  %v489_v61 = vsub.f32 1.0, %v488_v55  ;;  %vm509_vm0 = vmor %vm507_vm15, %vm508_vm13 }
  0xde   : > { %v393_v63 = vsel %vm390_vm9, %v392_v58, %v388_v60  ;;  %v395_v0 = vmul.f32 %v378_v59, %v1016_v13  ;;  %v397_v17 = vmul.f32 %v378_v59, %v1004_v9  ;;  %v399_v22 = vmul.f32 %v378_v59, %v994_v5 }
  0xdf   : > { %v396_v18 = vmul.f32 %v393_v63, %v1018_v14  ;;  %v398_v19 = vmul.f32 %v393_v63, %v1008_v10  ;;  %v490_v13 = vmul.f32 %v745_v51, %v489_v61  ;;  %v504_v9 = vsub.f32 1.0, %v503_v62 }
  0xe0   : > { %403 = vst [vmem:[%s1062_s17] sm:$0xff] %v395_v0  ;;  %v400_v10 = vmul.f32 %v393_v63, %v996_v6  ;;  %v401_v5 = vmul.f32 %v378_v59, %v984_v1  ;;  %v402_v25 = vmul.f32 %v393_v63, %v986_v2  ;;  %v511_v6 = vand.u32 2147483647, %v1047_v39 }
  0xe1   : > { %404 = vst [vmem:[%s1062_s17 + $0x8] sm:$0xff] %v396_v18  ;;  %v491_v14 = vadd.f32 %v745_v51, %v490_v13  ;;  %v505_v23 = vmul.f32 %v747_v56, %v504_v9 }
  0xe2   : > { %405 = vst [vmem:[%s1062_s17 + $0x10] sm:$0xff] %v397_v17  ;;  %vm512_vm1 = vcmp.eq.f32.partialorder %v511_v6, 8.507059e+37 }
  0xe3   : > { %406 = vst [vmem:[%s1062_s17 + $0x18] sm:$0xff] %v398_v19  ;;  %v495_v27 = vsel %vm494_vm12, %v745_v51, %v491_v14  ;;  %v506_v1 = vadd.f32 %v747_v56, %v505_v23 }
  0xe4   : > { %407 = vst [vmem:[%s1062_s17 + $0x20] sm:$0xff] %v399_v22  ;;  %v500_v28 = vsel %vm497_vm14, %v499_v26, %v495_v27 }
  0xe5   : > { %408 = vst [vmem:[%s1062_s17 + $0x28] sm:$0xff] %v400_v10  ;;  %v517_v2 = vmul.f32 %v500_v28, %v1022_v15  ;;  %v519_v29 = vmul.f32 %v500_v28, %v1010_v11  ;;  %v521_v30 = vmul.f32 %v500_v28, %v1000_v7  ;;  %v523_v32 = vmul.f32 %v500_v28, %v988_v3 }
  0xe6   : > { %409 = vst [vmem:[%s1062_s17 + $0x30] sm:$0xff] %v401_v5  ;;  %v510_v33 = vsel %vm509_vm0, %v747_v56, %v506_v1 }
  0xe7   : > { %410 = vst [vmem:[%s1062_s17 + $0x38] sm:$0xff] %v402_v25  ;;  %v515_v11 = vsel %vm512_vm1, %v514_v31, %v510_v33 }
  0xe8   : > { %525 = vst [vmem:[%s1062_s17 + $0x40] sm:$0xff] %v517_v2  ;;  %v518_v7 = vmul.f32 %v515_v11, %v1024_v16  ;;  %v520_v15 = vmul.f32 %v515_v11, %v1012_v12  ;;  %v522_v34 = vmul.f32 %v515_v11, %v1002_v8  ;;  %v524_v3 = vmul.f32 %v515_v11, %v992_v4 }
  0xe9   : > { %527 = vst [vmem:[%s1062_s17 + $0x50] sm:$0xff] %v519_v29 }
  0xea   : > { %529 = vst [vmem:[%s1062_s17 + $0x60] sm:$0xff] %v521_v30 }
  0xeb   : > { %531 = vst [vmem:[%s1062_s17 + $0x70] sm:$0xff] %v523_v32 }
  0xec   : > { %526 = vst [vmem:[%s1062_s17 + $0x48] sm:$0xff] %v518_v7 }
  0xed   : > { %528 = vst [vmem:[%s1062_s17 + $0x58] sm:$0xff] %v520_v15 }
  0xee   : > { %530 = vst [vmem:[%s1062_s17 + $0x68] sm:$0xff] %v522_v34 }
  0xef   : > { %532 = vst [vmem:[%s1062_s17 + $0x78] sm:$0xff] %v524_v3 }
  0xf0   : > { %805 = shalt.err (!%p802_p13)
}
  0xf1   : > { %s865_s28 = smov 256   ;;  %s866_s16 = smov 16  }
  0xf2   : > { %666 = dma.vmem_to_hbm [thread:$0]  (%p951_p9), %s550_s26, 2048, %s552_s30, %s534_s11, %s865_s28, %s865_s28, %s866_s16  }
  0xf3 PF: > { %s566_s17 = sand.u32 1, %s840_s20   ;;  %p673_p0 = pnand %p642_p12, %p958_p11 }
  0xf4   : > { %s567_s18 = scalar_lea.sflag [#allocation5], %s566_s17 }
  0xf5   : > { %p674_p1 = pneg %p673_p0 }
  0xf7   : > { %835 = dma.done.wait (%p674_p1), %s567_s18, 2048  }
  0xf8   : > { %837 = vsyncadd (%p674_p1), %s567_s18, 4294965248  ;;  %s22_s25 = sadd.s32 1, %s860_s25   ;;  %s1144_s20 = smov %s844_s21 }
  0xf9   : > { %p19_p2 = scmp.ge.s32.totalorder %s22_s25, 4   ;;  %s1145_s21 = smov %s848_s22 }
  0xfa   : > { %s1146_s22 = smov %s956_s8  ;;  %s1147_s23 = smov %s856_s24 }
  0xfb   : > { %s1148_s24 = smov %s1150_s27  ;;  %21 = sbr.rel (!%p19_p2) target bundleno = 8 (0x8), region = 85 }
 0x100   :  { %573 = vsyncpa [#allocation4], 1 }
 0x101   :  { %575 = vsyncpa [#allocation4 + $0x1], 1 }
 0x102   :  { %576 = vsyncpa [#allocation5], 1 }
 0x103   :  { %578 = vsyncpa [#allocation5 + $0x1], 1 }

</bundles_post_ra>
